<compile_context>
chip_gen: v7x
topology: tpu7x:2x2x1
jax: 0.10.0
libtpu: 0.0.40
codegen_flags: <defaults>
</compile_context>

<pallas_src>
import functools

import jax
import jax.numpy as jnp
from jax.experimental import pallas as pl
from jax.experimental.pallas import tpu as pltpu

_LANE = 128
_SUBLANE = 8


def _valuenet_kernel(x_ref, w1_ref, b1_ref, w2_ref, b2_ref, w3_ref, b3_ref, o_ref):
    """Fused 3-layer MLP: (relu o linear) x2 followed by a final linear."""
    x = x_ref[...]
    h1 = jnp.dot(x, w1_ref[...], preferred_element_type=jnp.float32) + b1_ref[...]
    h1 = jnp.maximum(h1, 0.0)
    h2 = jnp.dot(h1, w2_ref[...], preferred_element_type=jnp.float32) + b2_ref[...]
    h2 = jnp.maximum(h2, 0.0)
    q = jnp.dot(h2, w3_ref[...], preferred_element_type=jnp.float32) + b3_ref[...]
    o_ref[...] = q.astype(o_ref.dtype)


def _round_up(x: int, m: int) -> int:
    return ((x + m - 1) // m) * m


@functools.partial(jax.jit, static_argnames=("block_b",))
def value_net_forward(state, params, *, block_b=256):
    """Run ValueNet forward.

    state:  (B, in_size) f32
    params: (w1 (in,64), b1 (1,64), w2 (64,64), b2 (1,64), w3 (64,out), b3 (1,out))
    Returns (B, out_size) f32.
    """
    w1, b1, w2, b2, w3, b3 = params
    B, in_size = state.shape
    hidden = w1.shape[1]
    out_size = w3.shape[1]

    # ---- Pad all compute dims to MXU / vreg-friendly sizes (zeros are exact). ----
    k_pad = _round_up(max(in_size, _SUBLANE), _SUBLANE)   # layer-1 contraction dim
    h_pad = _round_up(max(hidden, _LANE), _LANE)          # hidden width -> lane-dense
    n_pad = _round_up(max(out_size, _LANE), _LANE)        # output lanes -> unmasked vst

    if k_pad != in_size:
        state = jnp.pad(state, ((0, 0), (0, k_pad - in_size)))
        w1 = jnp.pad(w1, ((0, k_pad - in_size), (0, 0)))
    if h_pad != hidden:
        w1 = jnp.pad(w1, ((0, 0), (0, h_pad - hidden)))
        b1 = jnp.pad(b1, ((0, 0), (0, h_pad - hidden)))
        w2 = jnp.pad(w2, ((0, h_pad - hidden), (0, h_pad - hidden)))
        b2 = jnp.pad(b2, ((0, 0), (0, h_pad - hidden)))
        w3 = jnp.pad(w3, ((0, h_pad - hidden), (0, 0)))
    if n_pad != out_size:
        w3 = jnp.pad(w3, ((0, 0), (0, n_pad - out_size)))
        b3 = jnp.pad(b3, ((0, 0), (0, n_pad - out_size)))

    # ---- Batch tiling: large MXU-friendly tile, zero-pad ragged batches. ----
    block = min(int(block_b), _round_up(B, _SUBLANE))
    block = max(_SUBLANE, _round_up(block, _SUBLANE))
    grid_b = pl.cdiv(B, block)
    b_padded = grid_b * block
    if b_padded != B:
        state = jnp.pad(state, ((0, b_padded - B), (0, 0)))

    q_padded = pl.pallas_call(
        _valuenet_kernel,
        out_shape=jax.ShapeDtypeStruct((b_padded, n_pad), jnp.float32),
        grid_spec=pltpu.PrefetchScalarGridSpec(
            num_scalar_prefetch=0,
            grid=(grid_b,),
            in_specs=[
                pl.BlockSpec((block, k_pad), lambda i: (i, 0)),   # state tile (streamed)
                pl.BlockSpec((k_pad, h_pad), lambda i: (0, 0)),   # W1 (resident)
                pl.BlockSpec((1, h_pad), lambda i: (0, 0)),       # b1 (resident)
                pl.BlockSpec((h_pad, h_pad), lambda i: (0, 0)),   # W2 (resident)
                pl.BlockSpec((1, h_pad), lambda i: (0, 0)),       # b2 (resident)
                pl.BlockSpec((h_pad, n_pad), lambda i: (0, 0)),   # W3 (resident)
                pl.BlockSpec((1, n_pad), lambda i: (0, 0)),       # b3 (resident)
            ],
            out_specs=pl.BlockSpec((block, n_pad), lambda i: (i, 0)),  # lane-dense q tile
        ),
        compiler_params=pltpu.CompilerParams(
            dimension_semantics=("parallel",),
        ),
    )(state, w1, b1, w2, b2, w3, b3)

    # Drop batch padding rows and output-lane padding columns.
    return q_padded[:B, :out_size]


def init_params(key, in_size, hidden, out_size):
    """Deterministic param init mimicking nn.Linear's uniform(-1/sqrt(fan_in), ...)."""
    ks = jax.random.split(key, 6)

    def linear(kw, kb, fan_in, fan_out):
        bound = 1.0 / jnp.sqrt(fan_in)
        # Stored as (in, out) so the kernel computes x @ W (PyTorch stores (out, in)).
        w = jax.random.uniform(kw, (fan_in, fan_out), jnp.float32, -bound, bound)
        b = jax.random.uniform(kb, (1, fan_out), jnp.float32, -bound, bound)
        return w, b

    w1, b1 = linear(ks[0], ks[1], in_size, hidden)
    w2, b2 = linear(ks[2], ks[3], hidden, hidden)
    w3, b3 = linear(ks[4], ks[5], hidden, out_size)
    return (w1, b1, w2, b2, w3, b3)


def _reference(state, params):
    w1, b1, w2, b2, w3, b3 = params
    x = jnp.maximum(state @ w1 + b1, 0.0)
    x = jnp.maximum(x @ w2 + b2, 0.0)
    return x @ w3 + b3


if __name__ == "__main__":
    # Small shapes consistent with the module: hidden width 64 is fixed by the
    # module; 8 state features, 4 actions.
    in_size, hidden, out_size = 8, 64, 4

    key = jax.random.PRNGKey(0)
    k_state, k_params, k_state2 = jax.random.split(key, 3)
    params = init_params(k_params, in_size, hidden, out_size)

    # Case 1: tiny batch (B=8) -> single grid step, exercises hidden/output
    # lane padding (64->128 and 4->128).
    B1 = 8
    state1 = jax.random.normal(k_state, (B1, in_size), jnp.float32)
    q1 = jax.block_until_ready(value_net_forward(state1, params))
    assert q1.shape == (B1, out_size)
    assert jnp.allclose(q1, _reference(state1, params), atol=1e-5, rtol=1e-5), \
        "mismatch vs JAX reference (B=8)"

    # Case 2: ragged batch (B=50) with block_b=32 -> 2 parallel grid steps +
    # batch zero-padding path (what a v7x run would shard across both TCs).
    B2 = 50
    state2 = jax.random.normal(k_state2, (B2, in_size), jnp.float32)
    q2 = jax.block_until_ready(value_net_forward(state2, params, block_b=32))
    assert q2.shape == (B2, out_size)
    assert jnp.allclose(q2, _reference(state2, params), atol=1e-5, rtol=1e-5), \
        "mismatch vs JAX reference (B=50, ragged)"

    print("KERNEL_OK")
</pallas_src>

<mosaic_0001>
module attributes {stable_mosaic.version = 11 : i64} {
  func.func @_valuenet_kernel(%arg0: i32, %arg1: memref<8x8xf32, #tpu.memory_space<vmem>>, %arg2: memref<8x128xf32, #tpu.memory_space<vmem>>, %arg3: memref<1x128xf32, #tpu.memory_space<vmem>>, %arg4: memref<128x128xf32, #tpu.memory_space<vmem>>, %arg5: memref<1x128xf32, #tpu.memory_space<vmem>>, %arg6: memref<128x128xf32, #tpu.memory_space<vmem>>, %arg7: memref<1x128xf32, #tpu.memory_space<vmem>>, %arg8: memref<8x128xf32, #tpu.memory_space<vmem>>) attributes {dimension_semantics = [#tpu.dimension_semantics<parallel>], iteration_bounds = array<i64: 1>, scalar_prefetch = 0 : i64, scratch_operands = 0 : i64, tpu.core_type = #tpu.core_type<tc>, window_params = [{transform_indices = @transform_0, window_bounds = array<i64: 8, 8>}, {pipeline_mode = #tpu.pipeline_mode<synchronous>, transform_indices = @transform_1, window_bounds = array<i64: 8, 128>}, {pipeline_mode = #tpu.pipeline_mode<synchronous>, transform_indices = @transform_2, window_bounds = array<i64: 1, 128>}, {pipeline_mode = #tpu.pipeline_mode<synchronous>, transform_indices = @transform_3, window_bounds = array<i64: 128, 128>}, {pipeline_mode = #tpu.pipeline_mode<synchronous>, transform_indices = @transform_4, window_bounds = array<i64: 1, 128>}, {pipeline_mode = #tpu.pipeline_mode<synchronous>, transform_indices = @transform_5, window_bounds = array<i64: 128, 128>}, {pipeline_mode = #tpu.pipeline_mode<synchronous>, transform_indices = @transform_6, window_bounds = array<i64: 1, 128>}, {transform_indices = @transform_7, window_bounds = array<i64: 8, 128>}]} {
    %c0 = arith.constant 0 : index
    %c0_0 = arith.constant 0 : index
    %0 = vector.load %arg1[%c0, %c0_0] : memref<8x8xf32, #tpu.memory_space<vmem>>, vector<8x8xf32>
    %c0_1 = arith.constant 0 : index
    %c0_2 = arith.constant 0 : index
    %1 = vector.load %arg2[%c0_1, %c0_2] : memref<8x128xf32, #tpu.memory_space<vmem>>, vector<8x128xf32>
    %cst = arith.constant dense<0.000000e+00> : vector<8x128xf32>
    %2 = tpu.matmul %0, %1, %cst {dimension_numbers = #tpu.dot_dimension_numbers<[1], [0], [0], [1], [0, 0, 1, 1], [], []>} : vector<8x8xf32>, vector<8x128xf32>, vector<8x128xf32> -> vector<8x128xf32>
    %c0_3 = arith.constant 0 : index
    %c0_4 = arith.constant 0 : index
    %3 = vector.load %arg3[%c0_3, %c0_4] : memref<1x128xf32, #tpu.memory_space<vmem>>, vector<1x128xf32>
    %4 = vector.broadcast %3 : vector<1x128xf32> to vector<8x128xf32>
    %5 = arith.addf %2, %4 : vector<8x128xf32>
    %cst_5 = arith.constant 0.000000e+00 : f32
    %6 = vector.broadcast %cst_5 : f32 to vector<8x128xf32>
    %7 = arith.maximumf %5, %6 : vector<8x128xf32>
    %c0_6 = arith.constant 0 : index
    %c0_7 = arith.constant 0 : index
    %8 = vector.load %arg4[%c0_6, %c0_7] : memref<128x128xf32, #tpu.memory_space<vmem>>, vector<128x128xf32>
    %cst_8 = arith.constant dense<0.000000e+00> : vector<8x128xf32>
    %9 = tpu.matmul %7, %8, %cst_8 {dimension_numbers = #tpu.dot_dimension_numbers<[1], [0], [0], [1], [0, 0, 1, 1], [], []>} : vector<8x128xf32>, vector<128x128xf32>, vector<8x128xf32> -> vector<8x128xf32>
    %c0_9 = arith.constant 0 : index
    %c0_10 = arith.constant 0 : index
    %10 = vector.load %arg5[%c0_9, %c0_10] : memref<1x128xf32, #tpu.memory_space<vmem>>, vector<1x128xf32>
    %11 = vector.broadcast %10 : vector<1x128xf32> to vector<8x128xf32>
    %12 = arith.addf %9, %11 : vector<8x128xf32>
    %cst_11 = arith.constant 0.000000e+00 : f32
    %13 = vector.broadcast %cst_11 : f32 to vector<8x128xf32>
    %14 = arith.maximumf %12, %13 : vector<8x128xf32>
    %c0_12 = arith.constant 0 : index
    %c0_13 = arith.constant 0 : index
    %15 = vector.load %arg6[%c0_12, %c0_13] : memref<128x128xf32, #tpu.memory_space<vmem>>, vector<128x128xf32>
    %cst_14 = arith.constant dense<0.000000e+00> : vector<8x128xf32>
    %16 = tpu.matmul %14, %15, %cst_14 {dimension_numbers = #tpu.dot_dimension_numbers<[1], [0], [0], [1], [0, 0, 1, 1], [], []>} : vector<8x128xf32>, vector<128x128xf32>, vector<8x128xf32> -> vector<8x128xf32>
    %c0_15 = arith.constant 0 : index
    %c0_16 = arith.constant 0 : index
    %17 = vector.load %arg7[%c0_15, %c0_16] : memref<1x128xf32, #tpu.memory_space<vmem>>, vector<1x128xf32>
    %18 = vector.broadcast %17 : vector<1x128xf32> to vector<8x128xf32>
    %19 = arith.addf %16, %18 : vector<8x128xf32>
    %c0_17 = arith.constant 0 : index
    %c0_18 = arith.constant 0 : index
    %20 = vector.load %arg8[%c0_17, %c0_18] : memref<8x128xf32, #tpu.memory_space<vmem>>, vector<8x128xf32>
    tpu.vector_store %arg8[%c0_17, %c0_18], %19 {strides = array<i32>} : memref<8x128xf32, #tpu.memory_space<vmem>>, vector<8x128xf32>,
    return
  }
  func.func @transform_0(%arg0: i32) -> (i32, i32) {
    %c0_i32 = arith.constant 0 : i32
    %c0_i32_0 = arith.constant 0 : i32
    return %arg0, %c0_i32 : i32, i32
  }
  func.func @transform_1(%arg0: i32) -> (i32, i32) {
    %c0_i32 = arith.constant 0 : i32
    %c0_i32_0 = arith.constant 0 : i32
    %c0_i32_1 = arith.constant 0 : i32
    return %c0_i32, %c0_i32_0 : i32, i32
  }
  func.func @transform_2(%arg0: i32) -> (i32, i32) {
    %c0_i32 = arith.constant 0 : i32
    %c0_i32_0 = arith.constant 0 : i32
    %c0_i32_1 = arith.constant 0 : i32
    return %c0_i32, %c0_i32_0 : i32, i32
  }
  func.func @transform_3(%arg0: i32) -> (i32, i32) {
    %c0_i32 = arith.constant 0 : i32
    %c0_i32_0 = arith.constant 0 : i32
    %c0_i32_1 = arith.constant 0 : i32
    return %c0_i32, %c0_i32_0 : i32, i32
  }
  func.func @transform_4(%arg0: i32) -> (i32, i32) {
    %c0_i32 = arith.constant 0 : i32
    %c0_i32_0 = arith.constant 0 : i32
    %c0_i32_1 = arith.constant 0 : i32
    return %c0_i32, %c0_i32_0 : i32, i32
  }
  func.func @transform_5(%arg0: i32) -> (i32, i32) {
    %c0_i32 = arith.constant 0 : i32
    %c0_i32_0 = arith.constant 0 : i32
    %c0_i32_1 = arith.constant 0 : i32
    return %c0_i32, %c0_i32_0 : i32, i32
  }
  func.func @transform_6(%arg0: i32) -> (i32, i32) {
    %c0_i32 = arith.constant 0 : i32
    %c0_i32_0 = arith.constant 0 : i32
    %c0_i32_1 = arith.constant 0 : i32
    return %c0_i32, %c0_i32_0 : i32, i32
  }
  func.func @transform_7(%arg0: i32) -> (i32, i32) {
    %c0_i32 = arith.constant 0 : i32
    %c0_i32_0 = arith.constant 0 : i32
    return %arg0, %c0_i32 : i32, i32
  }
}

</mosaic_0001>

<bundles_post_ra>
// kernel: value_net_forward.1
= control target key start
LH: loop header
LB: loop body
LE: loop exit
PB: predicated region body
PF: predicated region fallthrough
CT: control target
= control target key end

     0   :  { %vm35_vm0 = vcmask 64512   ;;  %v468_v0 = vmov 0.0   ;;  %vm469_vm1 = vmmov 0   ;;  %v470_v4 = vmov 0.0|0.0   ;;  %s641_s1 = inlined_call_operand.vmem [shape: f32[8,128], index: 1, kind: input, shape index: {}]   ;;  %s642_s0 = inlined_call_operand.vmem [shape: f32[8,8], index: 0, kind: input, shape index: {}]   ;;  %s643_s3 = inlined_call_operand.vmem [shape: f32[128,128], index: 3, kind: input, shape index: {}]   ;;  %s644_s5 = inlined_call_operand.vmem [shape: f32[128,128], index: 5, kind: input, shape index: {}]   ;;  %s645_s2 = inlined_call_operand.vmem [shape: f32[1,128], index: 2, kind: input, shape index: {}]   ;;  %s646_s4 = inlined_call_operand.vmem [shape: f32[1,128], index: 4, kind: input, shape index: {}]   ;;  %s647_s6 = inlined_call_operand.vmem [shape: f32[1,128], index: 6, kind: input, shape index: {}]   ;;  %s648_s7 = inlined_call_operand.vmem [shape: f32[8,128], index: 7, kind: output, shape index: {}]  }
   0x1   :  { %342 = vmatprep.subr.mxu0 %v468_v0  ;;  %v27_v1 = vld [vmem:[%s641_s1] sm:$0xff]  ;;  %344 = vmatprep.mubr.msk.f32.mxu0 %vm469_vm1, %v468_v0  ;;  %v111_v5 = vld [vmem:[%s643_s3 + $0x8] sm:$0xff]  ;;  %v112_v6 = vld [vmem:[%s643_s3 + $0x10] sm:$0xff] }
   0x2   :  { %v26_v2 = vld [vmem:[%s642_s0] sm:$0xff]  ;;  %343 = vmatpush3.msra.mxu0 %v27_v1  ;;  %417 = vmatprep.subr.bf16.mxu1 %v470_v4  ;;  %v113_v7 = vld [vmem:[%s643_s3 + $0x18] sm:$0xff]  ;;  %v115_v11 = vld [vmem:[%s643_s3 + $0x28] sm:$0xff] }
   0x3   :  { %v110_v3 = vld [vmem:[%s643_s3] sm:$0xff]  ;;  %345 = vmatmul.mubr.msk.f32.vlgmr.msra.gmra.mrb[0].mxu0 %vm35_vm0, %v26_v2  ;;  %379 = vmatprep.mubr.msk.f32.mxu1 %vm469_vm1, %v468_v0  ;;  %v421_v9 = vpack.c.bf16 %v113_v7, %v112_v6  ;;  %v116_v13 = vld [vmem:[%s643_s3 + $0x30] sm:$0xff]  ;;  %v117_v14 = vld [vmem:[%s643_s3 + $0x38] sm:$0xff] }
   0x4   :  { %v418_v8 = vpack.c.bf16 %v111_v5, %v110_v3  ;;  %441 = vmatprep.subr.bf16.mxu0 %v470_v4  ;;  %414 = vmatprep.mubr.msk.f32.mxu0 %vm469_vm1, %v468_v0  ;;  %v114_v10 = vld [vmem:[%s643_s3 + $0x20] sm:$0xff]  ;;  %v427_v15 = vpack.c.bf16 %v117_v14, %v116_v13  ;;  %v119_v17 = vld [vmem:[%s643_s3 + $0x48] sm:$0xff]  ;;  %v120_v19 = vld [vmem:[%s643_s3 + $0x50] sm:$0xff] }
   0x5   :  { %v424_v12 = vpack.c.bf16 %v115_v11, %v114_v10  ;;  %v118_v16 = vld [vmem:[%s643_s3 + $0x40] sm:$0xff]  ;;  %v121_v20 = vld [vmem:[%s643_s3 + $0x58] sm:$0xff]  ;;  %v123_v23 = vld [vmem:[%s643_s3 + $0x68] sm:$0xff] }
   0x6   :  { %419 = vmatpush3.bf16.msra.mxu1 %v418_v8  ;;  %v430_v18 = vpack.c.bf16 %v119_v17, %v118_v16  ;;  %v433_v21 = vpack.c.bf16 %v121_v20, %v120_v19  ;;  %v122_v22 = vld [vmem:[%s643_s3 + $0x60] sm:$0xff]  ;;  %v124_v25 = vld [vmem:[%s643_s3 + $0x70] sm:$0xff]  ;;  %v125_v26 = vld [vmem:[%s643_s3 + $0x78] sm:$0xff] }
   0x7   :  { %420 = vmatprep.subr.bf16.mxu1 %v470_v4  ;;  %v436_v24 = vpack.c.bf16 %v123_v23, %v122_v22  ;;  %v439_v27 = vpack.c.bf16 %v125_v26, %v124_v25  ;;  %v204_v28 = vld [vmem:[%s644_s5] sm:$0xff]  ;;  %v205_v29 = vld [vmem:[%s644_s5 + $0x8] sm:$0xff]  ;;  %v206_v30 = vld [vmem:[%s644_s5 + $0x10] sm:$0xff] }
   0x8   :  { %v442_v31 = vpack.c.bf16 %v205_v29, %v204_v28  ;;  %v207_v32 = vld [vmem:[%s644_s5 + $0x18] sm:$0xff]  ;;  %v208_v34 = vld [vmem:[%s644_s5 + $0x20] sm:$0xff]  ;;  %v209_v35 = vld [vmem:[%s644_s5 + $0x28] sm:$0xff] }
   0x9   :  { %v445_v33 = vpack.c.bf16 %v207_v32, %v206_v30  ;;  %v448_v36 = vpack.c.bf16 %v209_v35, %v208_v34  ;;  %v210_v37 = vld [vmem:[%s644_s5 + $0x30] sm:$0xff]  ;;  %v211_v38 = vld [vmem:[%s644_s5 + $0x38] sm:$0xff]  ;;  %v212_v40 = vld [vmem:[%s644_s5 + $0x40] sm:$0xff] }
   0xa   :  { %422 = vmatpush3.bf16.msra.mxu1 %v421_v9  ;;  %443 = vmatpush3.bf16.msra.mxu0 %v442_v31  ;;  %v451_v39 = vpack.c.bf16 %v211_v38, %v210_v37  ;;  %v213_v41 = vld [vmem:[%s644_s5 + $0x48] sm:$0xff]  ;;  %v214_v43 = vld [vmem:[%s644_s5 + $0x50] sm:$0xff]  ;;  %v215_v44 = vld [vmem:[%s644_s5 + $0x58] sm:$0xff] }
   0xb   :  { %423 = vmatprep.subr.bf16.mxu1 %v470_v4  ;;  %444 = vmatprep.subr.bf16.mxu0 %v470_v4  ;;  %v454_v42 = vpack.c.bf16 %v213_v41, %v212_v40  ;;  %v457_v45 = vpack.c.bf16 %v215_v44, %v214_v43  ;;  %v216_v46 = vld [vmem:[%s644_s5 + $0x60] sm:$0xff]  ;;  %v217_v47 = vld [vmem:[%s644_s5 + $0x68] sm:$0xff]  ;;  %v218_v54 = vld [vmem:[%s644_s5 + $0x70] sm:$0xff] }
   0xc   :  { %v460_v48 = vpack.c.bf16 %v217_v47, %v216_v46  ;;  %v302_v49 = vld [vmem:[%s645_s2] ss:$0 sm:$0xff]  ;;  %v219_v55 = vld [vmem:[%s644_s5 + $0x78] sm:$0xff] }
   0xd   :  { %v463_v56 = vpack.c.bf16 %v219_v55, %v218_v54  ;;  %v304_v57 = vld [vmem:[%s646_s4] ss:$0 sm:$0xff] }
   0xe   :  { %425 = vmatpush3.bf16.msra.mxu1 %v424_v12  ;;  %446 = vmatpush3.bf16.msra.mxu0 %v445_v33  ;;  %v305_v62 = vld [vmem:[%s647_s6] ss:$0 sm:$0xff] }
   0xf   :  { %426 = vmatprep.subr.bf16.mxu1 %v470_v4  ;;  %447 = vmatprep.subr.bf16.mxu0 %v470_v4 }
  0x12   :  { %428 = vmatpush3.bf16.msra.mxu1 %v427_v15  ;;  %449 = vmatpush3.bf16.msra.mxu0 %v448_v36 }
  0x13   :  { %429 = vmatprep.subr.bf16.mxu1 %v470_v4  ;;  %450 = vmatprep.subr.bf16.mxu0 %v470_v4 }
  0x16   :  { %431 = vmatpush3.bf16.msra.mxu1 %v430_v18  ;;  %452 = vmatpush3.bf16.msra.mxu0 %v451_v39 }
  0x17   :  { %432 = vmatprep.subr.bf16.mxu1 %v470_v4  ;;  %453 = vmatprep.subr.bf16.mxu0 %v470_v4 }
  0x1a   :  { %434 = vmatpush3.bf16.msra.mxu1 %v433_v21  ;;  %455 = vmatpush3.bf16.msra.mxu0 %v454_v42 }
  0x1b   :  { %435 = vmatprep.subr.bf16.mxu1 %v470_v4  ;;  %456 = vmatprep.subr.bf16.mxu0 %v470_v4 }
  0x1e   :  { %437 = vmatpush3.bf16.msra.mxu1 %v436_v24  ;;  %458 = vmatpush3.bf16.msra.mxu0 %v457_v45 }
  0x1f   :  { %438 = vmatprep.subr.bf16.mxu1 %v470_v4  ;;  %459 = vmatprep.subr.bf16.mxu0 %v470_v4 }
  0x22   :  { %440 = vmatpush3.bf16.msra.mxu1 %v439_v27  ;;  %461 = vmatpush3.bf16.msra.mxu0 %v460_v48 }
  0x23   :  { %462 = vmatprep.subr.bf16.mxu0 %v470_v4 }
  0x26   :  { %464 = vmatpush3.bf16.msra.mxu0 %v463_v56 }
  0xd6   :  { %v105_v50 = vpop.f32.mrb[0].mxu0 }
  0xd7   :  { %v106_v51 = vadd.f32 %v302_v49, %v105_v50  ;;  %v346_v52 = vpop.f32.mrb[1].mxu0 }
  0xd9   :  { %v109_v53 = vmax.f32 %v106_v51, 0.0 }
  0xdb   :  { %380 = vmatmul.mubr.f32.vlgmr.msra.gmra.mrb[0].mxu1 %v109_v53 }
 0x1ae   :  { %v199_v58 = vpop.f32.mrb[0].mxu1 }
 0x1af   :  { %v200_v59 = vadd.f32 %v304_v57, %v199_v58  ;;  %v381_v60 = vpop.f32.mrb[1].mxu1 }
 0x1b1   :  { %v203_v61 = vmax.f32 %v200_v59, 0.0 }
 0x1b3   :  { %415 = vmatmul.mubr.f32.vlgmr.msra.gmra.mrb[2].mxu0 %v203_v61 }
 0x286   :  { %v293_v63 = vpop.f32.mrb[2].mxu0 }
 0x287   :  { %v294_v0 = vadd.f32 %v305_v62, %v293_v63  ;;  %v416_v1 = vpop.f32.mrb[3].mxu0 }
 0x289   :  { %297 = vst [vmem:[%s648_s7] sm:$0xff] %v294_v0 }

</bundles_post_ra>
